<compile_context>
chip_gen: v7x
topology: tpu7x:2x2x1
jax: 0.10.0
libtpu: 0.0.40
codegen_flags: <defaults>
</compile_context>

<pallas_src>
import numpy as np
import jax
import jax.numpy as jnp
from jax import lax
from jax.experimental import pallas as pl
from jax.experimental.pallas import tpu as pltpu

MIN_DEPTH = 0.1   # matches _forward_test: plane_to_depth(..., min_depth=0.1, max_depth=10)
MAX_DEPTH = 10.0


def _round_up(x, m):
    return ((x + m - 1) // m) * m


# ----------------------------------------------------------------------------
# Kernel 1: plane_to_depth — grid over planes.  Per grid step we see one
# plane's (1, H, W) mask block and emit its (1, 3, H, W) xyz block; the camera
# rays and the running min-depth / mask-sum accumulators live in VMEM scratch.
# ----------------------------------------------------------------------------
def _plane_to_depth_kernel(kinv_ref, normals_ref, depth_ref, mask_ref,
                           depth_out_ref, plane_xyz_ref,
                           rays_ref, minmap_ref, masksum_ref):
    n = pl.program_id(0)
    num_planes = pl.num_programs(0)
    H, W = depth_ref.shape

    # One-time setup (first plane): camera rays K^-1 @ [x, y, 1]^T plus the
    # min-depth / mask-sum accumulators.
    @pl.when(n == 0)
    def _init():
        xs = lax.broadcasted_iota(jnp.int32, (H, W), 1).astype(jnp.float32)
        ys = lax.broadcasted_iota(jnp.int32, (H, W), 0).astype(jnp.float32)
        for c in range(3):
            rays_ref[c, :, :] = (kinv_ref[c, 0] * xs + kinv_ref[c, 1] * ys
                                 + kinv_ref[c, 2])
        minmap_ref[...] = jnp.full((H, W), jnp.inf, jnp.float32)
        masksum_ref[...] = jnp.zeros((H, W), jnp.float32)

    np_depth = depth_ref[...]                       # already clamped in wrapper
    m = mask_ref[0, :, :]
    g0 = rays_ref[0, :, :]
    g1 = rays_ref[1, :, :]
    g2 = rays_ref[2, :, :]

    a = normals_ref[n, 0]                           # pre-normalized in wrapper
    b = normals_ref[n, 1]
    c = normals_ref[n, 2]

    dot_grid = a * g0 + b * g1 + c * g2             # n . grid           (H, W)
    dot_pts = dot_grid * np_depth                   # n . (grid * depth) (H, W)

    # offsets = sum(n.points * mask) / sum(mask); guard empty masks (0/0 NaN;
    # intentional deviation from the reference, which NaNs on an empty mask).
    offset = jnp.sum(dot_pts * m) / jnp.maximum(jnp.sum(m), 1e-10)

    # NOTE: pl.reciprocal(approx=True)+Newton would push this divide onto the
    # EUP, but the kernel is writeback-bound, so keep the exact divide.
    piece = offset / (dot_grid + 1e-10)             # plane_piece_depths
    piece = piece * m
    piece = jnp.where(piece < 1e-4, 1e4, piece)

    minmap_ref[...] = jnp.minimum(minmap_ref[...], piece)
    masksum_ref[...] = masksum_ref[...] + m

    piece_cl = jnp.clip(piece, MIN_DEPTH, MAX_DEPTH)
    plane_xyz_ref[0, 0, :, :] = (piece_cl * g0).astype(plane_xyz_ref.dtype)
    plane_xyz_ref[0, 1, :, :] = (piece_cl * g1).astype(plane_xyz_ref.dtype)
    plane_xyz_ref[0, 2, :, :] = (piece_cl * g2).astype(plane_xyz_ref.dtype)

    # depth_out has a constant block index -> single writeback at grid end
    # (Pallas revisit semantics), so writing it only on the last plane is safe.
    @pl.when(n == num_planes - 1)
    def _finalize():
        pred_plane_mask = masksum_ref[...] > 0.0
        depth = jnp.where(pred_plane_mask, minmap_ref[...], np_depth)
        depth_out_ref[...] = jnp.clip(depth, MIN_DEPTH, MAX_DEPTH)


def _camera_rays(kinv, h, w):
    """Plain-JAX camera rays K^-1 @ [x, y, 1] (N==1 fallback + references)."""
    ys, xs = jnp.meshgrid(jnp.arange(h, dtype=jnp.float32),
                          jnp.arange(w, dtype=jnp.float32), indexing="ij")
    grid = jnp.stack([xs, ys, jnp.ones_like(xs)], 0)
    return (kinv @ grid.reshape(3, -1)).reshape(3, h, w)


def plane_to_depth(intrinsic, np_depth, masks, normals, *,
                   xyz_dtype=jnp.bfloat16):
    """Pallas version of PlaneRCNNRefine.plane_to_depth (for_refine=True path).

    xyz_dtype=bf16 halves the dominant (N, 3, H, W) HBM writeback (production
    default); pass jnp.float32 for exact parity with the reference.
    """
    N, H, W = masks.shape
    kinv = jnp.linalg.inv(intrinsic[:3, :3]).astype(jnp.float32)          # glue
    normals = normals.astype(jnp.float32)
    normals = normals / (jnp.linalg.norm(normals, axis=-1, keepdims=True) + 1e-10)
    depth_c = jnp.clip(np_depth.astype(jnp.float32), MIN_DEPTH, MAX_DEPTH)

    if N <= 1:
        # PyTorch for_refine path with a single (background) mask: raw depth +
        # back-projected points.
        rays = _camera_rays(kinv, H, W)
        return depth_c, (rays * depth_c)[None].astype(xyz_dtype)

    # Pad spatial dims to TPU tile alignment.  bf16 xyz stores want a (16,128)
    # tile, f32 an (8,128) one; padded mask pixels are zero so they do not
    # perturb the offsets, and the padded output region is sliced away below.
    xyz_bytes = np.dtype(xyz_dtype).itemsize
    h_align = 16 if xyz_bytes == 2 else 8
    Hp, Wp = _round_up(H, h_align), _round_up(W, 128)
    depth_p = jnp.pad(depth_c, ((0, Hp - H), (0, Wp - W)), constant_values=1.0)
    masks_p = jnp.pad(masks.astype(jnp.float32),
                      ((0, 0), (0, Hp - H), (0, Wp - W)))

    # VMEM per grid step (independent of N): mask (2 bufs) + depth in (1 buf,
    # Buffered(1)) + depth out (2 bufs) + rays/min/sum scratch + xyz (2 bufs).
    est = Hp * Wp * (4 * (2 + 1 + 2 + 3 + 1 + 1) + 2 * 3 * xyz_bytes)
    # Cap below v7x's 64 MiB physical VMEM to leave compiler headroom.
    vmem_limit = int(min(48 * 2**20, max(16 * 2**20, int(1.3 * est))))

    # TODO(synk): v7x two-pass variant (offsets via one MXU matmul, then a
    #             row-tiled pixel pass with a "parallel" H axis over both
    #             TensorCores) is not implemented; single-TC chips are served
    #             by this per-frame-resident plane-grid form.
    depth_out, plane_xyz = pl.pallas_call(
        _plane_to_depth_kernel,
        out_shape=(
            jax.ShapeDtypeStruct((Hp, Wp), jnp.float32),
            jax.ShapeDtypeStruct((N, 3, Hp, Wp), xyz_dtype),
        ),
        grid=(N,),
        in_specs=[
            pl.BlockSpec(memory_space=pltpu.MemorySpace.SMEM),          # K^-1
            pl.BlockSpec(memory_space=pltpu.MemorySpace.SMEM),          # normals
            pl.BlockSpec((Hp, Wp), lambda n: (0, 0),
                         pipeline_mode=pl.Buffered(1)),                 # depth (const idx)
            pl.BlockSpec((1, Hp, Wp), lambda n: (n, 0, 0)),             # mask[n]
        ],
        out_specs=(
            pl.BlockSpec((Hp, Wp), lambda n: (0, 0)),                   # planar depth
            pl.BlockSpec((1, 3, Hp, Wp), lambda n: (n, 0, 0, 0)),       # xyz[n]
        ),
        scratch_shapes=[
            pltpu.VMEM((3, Hp, Wp), jnp.float32),   # camera rays (built once)
            pltpu.VMEM((Hp, Wp), jnp.float32),      # running min plane depth
            pltpu.VMEM((Hp, Wp), jnp.float32),      # running mask sum
        ],
        compiler_params=pltpu.CompilerParams(
            dimension_semantics=("arbitrary",),      # accumulates across planes
            vmem_limit_bytes=vmem_limit),
    )(kinv, normals, depth_p, masks_p)

    return depth_out[:H, :W], plane_xyz[:, :, :H, :W]


# ----------------------------------------------------------------------------
# Kernel 2: get_mask_iou — pairwise IoU between two sets of binary masks,
# tiled along the H*W contraction axis with a resident (P, T) accumulator.
# Operands arrive as 1-byte int8 {0,1} and are upcast in VMEM.
# ----------------------------------------------------------------------------
def _mask_iou_kernel(a_ref, b_ref, iou_ref, acc_ref, s1_ref, s2_ref):
    k = pl.program_id(0)

    @pl.when(k == 0)
    def _init():
        acc_ref[...] = jnp.zeros_like(acc_ref)
        s1_ref[...] = jnp.zeros_like(s1_ref)
        s2_ref[...] = jnp.zeros_like(s2_ref)

    # int8 -> f32 on the VPU (it has slack); bf16 operands keep the MXU fast
    # while preferred_element_type=f32 keeps the {0,1} accumulation exact.
    a32 = a_ref[...].astype(jnp.float32)              # (P, hw_blk)
    b32 = b_ref[...].astype(jnp.float32)              # (hw_blk, T)
    acc_ref[...] += lax.dot_general(
        a32.astype(jnp.bfloat16), b32.astype(jnp.bfloat16),
        (((1,), (0,)), ((), ())),                     # canonical (M,K)x(K,N)
        preferred_element_type=jnp.float32)
    s1_ref[...] += jnp.sum(a32, axis=1, keepdims=True)   # |A| partials (P, 1)
    s2_ref[...] += jnp.sum(b32, axis=0, keepdims=True)   # |B| partials (1, T)

    @pl.when(k == pl.num_programs(0) - 1)
    def _finalize():
        inter = acc_ref[...]
        union = s1_ref[...] + s2_ref[...] - inter
        iou_ref[...] = inter / (union + 1e-4)


def _pick_hw_block(hw, max_blk):
    """Pick a lane-aligned HW tile; prefer an exact divisor of hw so the
    dominant A operand needs no zero-pad pass in the wrapper."""
    max_blk = max(128, (max_blk // 128) * 128)
    if hw % 128 == 0:
        blk = min(max_blk, hw)
        while blk >= max(128, max_blk // 4):
            if hw % blk == 0:
                return blk, hw                        # exact tiling, no padding
            blk -= 128
    blk = min(max_blk, _round_up(hw, 128))
    return blk, _round_up(hw, blk)


def get_mask_iou(pred_masks, target_masks, *, hw_block=8192):
    """Pallas version of PlaneRCNNRefine.get_mask_iou for binary {0,1} masks."""
    P, H, W = pred_masks.shape
    T = target_masks.shape[0]
    HW = H * W
    if P == 0 or T == 0:
        return jnp.zeros((P, T), jnp.float32)

    # Masks stream from HBM as 1 byte/pixel; B is pre-transposed to (HW, T)
    # so the MXU sees a canonical (M,K)x(K,N) contraction (T is tiny).
    a = pred_masks.reshape(P, HW).astype(jnp.int8)
    b = jnp.transpose(target_masks.reshape(T, HW)).astype(jnp.int8)

    hw_blk, HWp = _pick_hw_block(HW, hw_block)
    if HWp != HW:
        a = jnp.pad(a, ((0, 0), (0, HWp - HW)))      # zero pixels contribute 0
        b = jnp.pad(b, ((0, HWp - HW), (0, 0)))

    # P / T are left unpadded: their blocks equal the full array dims, so no
    # wrapper pad pass over the dominant A operand and no 128-wide B padding.
    iou = pl.pallas_call(
        _mask_iou_kernel,
        out_shape=jax.ShapeDtypeStruct((P, T), jnp.float32),
        grid=(HWp // hw_blk,),
        in_specs=[
            pl.BlockSpec((P, hw_blk), lambda k: (0, k)),
            pl.BlockSpec((hw_blk, T), lambda k: (k, 0)),
        ],
        out_specs=pl.BlockSpec((P, T), lambda k: (0, 0)),
        scratch_shapes=[
            pltpu.VMEM((P, T), jnp.float32),   # intersection accumulator
            pltpu.VMEM((P, 1), jnp.float32),   # |A| partial sums
            pltpu.VMEM((1, T), jnp.float32),   # |B| partial sums
        ],
        compiler_params=pltpu.CompilerParams(
            dimension_semantics=("arbitrary",),   # HW is a reduction axis
            vmem_limit_bytes=48 * 2**20),
    )(a, b)
    return iou


def match_mask_targets_to_proposals(pred_masks, target_masks, iou_thresh=0.5):
    """Glue around the IoU kernel (argmax / threshold are tiny)."""
    iou = get_mask_iou(pred_masks > 0.5, target_masks > 0.5)
    matched_idxs = jnp.argmax(iou, axis=-1)
    pos_idxs = jnp.max(iou, axis=-1) > iou_thresh
    return matched_idxs, pos_idxs


# ----------------------------------------------------------------------------
# "Forward" driver mimicking the refine branch of _forward_test.
# ----------------------------------------------------------------------------
def planercnn_refine_forward_test(intrinsic, depth, masks, normals,
                                  target_masks):
    # TODO(synk): backbone / RPN / ROI heads / depth head / refine CNN are
    #             external build_* sub-networks with no definition in this
    #             module; their detection outputs (depth, masks, normals) are
    #             taken as inputs here.
    # TODO(synk): prepare_refine's F.interpolate bilinear resizes are not
    #             reproduced; inputs are assumed to already be at refine_size.
    planar_depth, plane_xyz = plane_to_depth(intrinsic, depth, masks, normals,
                                             xyz_dtype=jnp.bfloat16)
    matched_idxs, pos_idxs = match_mask_targets_to_proposals(masks, target_masks)
    return {
        "planar_depth": planar_depth,
        "plane_xyz": plane_xyz,
        "matched_idxs": matched_idxs,
        "pos_idxs": pos_idxs,
    }


# ----------------------------------------------------------------------------
# Pure-JAX references for verification.
# ----------------------------------------------------------------------------
def plane_to_depth_ref(intrinsic, np_depth, masks, normals):
    H, W = np_depth.shape
    N = masks.shape[0]
    np_depth = jnp.clip(np_depth, MIN_DEPTH, MAX_DEPTH)
    kinv = jnp.linalg.inv(intrinsic[:3, :3])
    grid = _camera_rays(kinv, H, W)
    points = grid * np_depth
    normals = normals / (jnp.linalg.norm(normals, axis=-1, keepdims=True) + 1e-10)
    dots_pts = (normals @ points.reshape(3, -1)).reshape(N, H, W)
    offsets = (dots_pts * masks).sum((-1, -2)) / masks.sum((-1, -2))
    dots_grid = (normals @ grid.reshape(3, -1)).reshape(N, H, W)
    piece = offsets[:, None, None] / (dots_grid + 1e-10)
    piece = piece * masks
    piece = jnp.where(piece < 1e-4, 1e4, piece)
    plane_depth_map = piece.min(0)
    pred_plane_mask = masks.sum(0) > 0
    depth = jnp.where(pred_plane_mask, plane_depth_map, np_depth)
    depth = jnp.clip(depth, MIN_DEPTH, MAX_DEPTH)
    plane_xyz = jnp.clip(piece, MIN_DEPTH, MAX_DEPTH)[:, None] * grid[None]
    return depth, plane_xyz


def mask_iou_ref(m1, m2):
    m1 = m1[:, None]
    m2 = m2[None]
    i = jnp.logical_and(m1, m2).sum((-1, -2)).astype(jnp.float32)
    u = jnp.logical_or(m1, m2).sum((-1, -2)).astype(jnp.float32)
    return i / (u + 1e-4)


# ----------------------------------------------------------------------------
if __name__ == "__main__":
    key = jax.random.PRNGKey(0)
    H, W = 32, 128          # synthetic refine_size (small, lane-aligned)
    N = 4                   # detected planes
    T = 3                   # target (ground-truth) masks

    k_depth, k_mask, k_nrm, k_tgt = jax.random.split(key, 4)

    intrinsic = jnp.array([[100.0, 0.0, W / 2.0],
                           [0.0, 100.0, H / 2.0],
                           [0.0, 0.0, 1.0]], jnp.float32)
    depth = jax.random.uniform(k_depth, (H, W), jnp.float32, 0.5, 5.0)
    masks = jax.random.uniform(k_mask, (N, H, W), jnp.float32, 0.0, 1.0)
    # normals with a dominant +z component (front-facing planes)
    nxy = 0.2 * jax.random.normal(k_nrm, (N, 2), jnp.float32)
    normals = jnp.concatenate([nxy, jnp.ones((N, 1), jnp.float32)], axis=-1)
    target_masks = (jax.random.uniform(k_tgt, (T, H, W), jnp.float32) > 0.5
                    ).astype(jnp.float32)

    # production path (bf16 plane_xyz writeback)
    out = planercnn_refine_forward_test(intrinsic, depth, masks, normals,
                                        target_masks)
    jax.block_until_ready(out)

    # correctness checks against pure-JAX references
    d_ref, xyz_ref = plane_to_depth_ref(intrinsic, depth, masks, normals)

    # exact-parity f32 xyz path
    d_f32, xyz_f32 = plane_to_depth(intrinsic, depth, masks, normals,
                                    xyz_dtype=jnp.float32)
    assert jnp.allclose(d_f32, d_ref, rtol=1e-4, atol=1e-4)
    assert jnp.allclose(xyz_f32, xyz_ref, rtol=1e-4, atol=1e-4)

    # bf16 production path: depth is computed in f32 (tight); xyz within bf16
    # rounding of the reference.
    assert jnp.allclose(out["planar_depth"], d_ref, rtol=1e-4, atol=1e-4)
    assert jnp.allclose(out["plane_xyz"].astype(jnp.float32), xyz_ref,
                        rtol=2e-2, atol=2e-2)

    iou_pal = get_mask_iou(masks > 0.5, target_masks > 0.5)
    iou_ref = mask_iou_ref(masks > 0.5, target_masks > 0.5)
    assert jnp.allclose(iou_pal, iou_ref, rtol=1e-5, atol=1e-5)

    print("KERNEL_OK")
</pallas_src>

<mosaic_0001>
module attributes {stable_mosaic.version = 11 : i64} {
  func.func @_plane_to_depth_kernel(%arg0: i32, %arg1: memref<3x3xf32, #tpu.memory_space<smem>>, %arg2: memref<4x3xf32, #tpu.memory_space<smem>>, %arg3: memref<32x128xf32, #tpu.memory_space<vmem>>, %arg4: memref<1x32x128xf32, #tpu.memory_space<vmem>>, %arg5: memref<32x128xf32, #tpu.memory_space<vmem>>, %arg6: memref<1x3x32x128xbf16, #tpu.memory_space<vmem>>, %arg7: memref<3x32x128xf32, #tpu.memory_space<vmem>>, %arg8: memref<32x128xf32, #tpu.memory_space<vmem>>, %arg9: memref<32x128xf32, #tpu.memory_space<vmem>>) attributes {dimension_semantics = [#tpu.dimension_semantics<arbitrary>], iteration_bounds = array<i64: 4>, scalar_prefetch = 0 : i64, scratch_operands = 3 : i64, tpu.core_type = #tpu.core_type<tc>, window_params = [{transform_indices = @transform_0, window_bounds = array<i64: 3, 3>}, {transform_indices = @transform_1, window_bounds = array<i64: 4, 3>}, {pipeline_mode = #tpu.pipeline_mode<synchronous>, transform_indices = @transform_2, window_bounds = array<i64: 32, 128>}, {transform_indices = @transform_3, window_bounds = array<i64: 1, 32, 128>}, {pipeline_mode = #tpu.pipeline_mode<synchronous>, transform_indices = @transform_4, window_bounds = array<i64: 32, 128>}, {transform_indices = @transform_5, window_bounds = array<i64: 1, 3, 32, 128>}]} {
    %c0_i32 = arith.constant 0 : i32
    %0 = arith.cmpi eq, %arg0, %c0_i32 : i32
    %1 = arith.extui %0 : i1 to i32
    %c0_i32_0 = arith.constant 0 : i32
    %2 = arith.cmpi ne, %1, %c0_i32_0 : i32
    scf.if %2 {
      %75 = tpu.iota {dimensions = array<i32: 1>} : vector<32x128xi32>
      %76 = arith.sitofp %75 : vector<32x128xi32> to vector<32x128xf32>
      %77 = tpu.iota {dimensions = array<i32: 0>} : vector<32x128xi32>
      %78 = arith.sitofp %77 : vector<32x128xi32> to vector<32x128xf32>
      %c0_43 = arith.constant 0 : index
      %c0_44 = arith.constant 0 : index
      %79 = memref.load %arg1[%c0_43, %c0_44] : memref<3x3xf32, #tpu.memory_space<smem>>
      %80 = vector.broadcast %79 : f32 to vector<32x128xf32>
      %81 = arith.mulf %80, %76 : vector<32x128xf32>
      %c0_45 = arith.constant 0 : index
      %c1_46 = arith.constant 1 : index
      %82 = memref.load %arg1[%c0_45, %c1_46] : memref<3x3xf32, #tpu.memory_space<smem>>
      %83 = vector.broadcast %82 : f32 to vector<32x128xf32>
      %84 = arith.mulf %83, %78 : vector<32x128xf32>
      %85 = arith.addf %81, %84 : vector<32x128xf32>
      %c0_47 = arith.constant 0 : index
      %c2_48 = arith.constant 2 : index
      %86 = memref.load %arg1[%c0_47, %c2_48] : memref<3x3xf32, #tpu.memory_space<smem>>
      %87 = vector.broadcast %86 : f32 to vector<32x128xf32>
      %88 = arith.addf %85, %87 : vector<32x128xf32>
      %c0_49 = arith.constant 0 : index
      %c0_50 = arith.constant 0 : index
      %c0_51 = arith.constant 0 : index
      %89 = vector.load %arg7[%c0_49, %c0_50, %c0_51] : memref<3x32x128xf32, #tpu.memory_space<vmem>>, vector<1x32x128xf32>
      %90 = vector.shape_cast %89 : vector<1x32x128xf32> to vector<32x128xf32>
      %91 = vector.shape_cast %88 : vector<32x128xf32> to vector<1x32x128xf32>
      tpu.vector_store %arg7[%c0_49, %c0_50, %c0_51], %91 {strides = array<i32>} : memref<3x32x128xf32, #tpu.memory_space<vmem>>, vector<1x32x128xf32>,
      %c1_52 = arith.constant 1 : index
      %c0_53 = arith.constant 0 : index
      %92 = memref.load %arg1[%c1_52, %c0_53] : memref<3x3xf32, #tpu.memory_space<smem>>
      %93 = vector.broadcast %92 : f32 to vector<32x128xf32>
      %94 = arith.mulf %93, %76 : vector<32x128xf32>
      %c1_54 = arith.constant 1 : index
      %c1_55 = arith.constant 1 : index
      %95 = memref.load %arg1[%c1_54, %c1_55] : memref<3x3xf32, #tpu.memory_space<smem>>
      %96 = vector.broadcast %95 : f32 to vector<32x128xf32>
      %97 = arith.mulf %96, %78 : vector<32x128xf32>
      %98 = arith.addf %94, %97 : vector<32x128xf32>
      %c1_56 = arith.constant 1 : index
      %c2_57 = arith.constant 2 : index
      %99 = memref.load %arg1[%c1_56, %c2_57] : memref<3x3xf32, #tpu.memory_space<smem>>
      %100 = vector.broadcast %99 : f32 to vector<32x128xf32>
      %101 = arith.addf %98, %100 : vector<32x128xf32>
      %c1_58 = arith.constant 1 : index
      %c0_59 = arith.constant 0 : index
      %c0_60 = arith.constant 0 : index
      %102 = vector.load %arg7[%c1_58, %c0_59, %c0_60] : memref<3x32x128xf32, #tpu.memory_space<vmem>>, vector<1x32x128xf32>
      %103 = vector.shape_cast %102 : vector<1x32x128xf32> to vector<32x128xf32>
      %104 = vector.shape_cast %101 : vector<32x128xf32> to vector<1x32x128xf32>
      tpu.vector_store %arg7[%c1_58, %c0_59, %c0_60], %104 {strides = array<i32>} : memref<3x32x128xf32, #tpu.memory_space<vmem>>, vector<1x32x128xf32>,
      %c2_61 = arith.constant 2 : index
      %c0_62 = arith.constant 0 : index
      %105 = memref.load %arg1[%c2_61, %c0_62] : memref<3x3xf32, #tpu.memory_space<smem>>
      %106 = vector.broadcast %105 : f32 to vector<32x128xf32>
      %107 = arith.mulf %106, %76 : vector<32x128xf32>
      %c2_63 = arith.constant 2 : index
      %c1_64 = arith.constant 1 : index
      %108 = memref.load %arg1[%c2_63, %c1_64] : memref<3x3xf32, #tpu.memory_space<smem>>
      %109 = vector.broadcast %108 : f32 to vector<32x128xf32>
      %110 = arith.mulf %109, %78 : vector<32x128xf32>
      %111 = arith.addf %107, %110 : vector<32x128xf32>
      %c2_65 = arith.constant 2 : index
      %c2_66 = arith.constant 2 : index
      %112 = memref.load %arg1[%c2_65, %c2_66] : memref<3x3xf32, #tpu.memory_space<smem>>
      %113 = vector.broadcast %112 : f32 to vector<32x128xf32>
      %114 = arith.addf %111, %113 : vector<32x128xf32>
      %c2_67 = arith.constant 2 : index
      %c0_68 = arith.constant 0 : index
      %c0_69 = arith.constant 0 : index
      %115 = vector.load %arg7[%c2_67, %c0_68, %c0_69] : memref<3x32x128xf32, #tpu.memory_space<vmem>>, vector<1x32x128xf32>
      %116 = vector.shape_cast %115 : vector<1x32x128xf32> to vector<32x128xf32>
      %117 = vector.shape_cast %114 : vector<32x128xf32> to vector<1x32x128xf32>
      tpu.vector_store %arg7[%c2_67, %c0_68, %c0_69], %117 {strides = array<i32>} : memref<3x32x128xf32, #tpu.memory_space<vmem>>, vector<1x32x128xf32>,
      %cst_70 = arith.constant 0x7F800000 : f32
      %118 = vector.broadcast %cst_70 : f32 to vector<32x128xf32>
      %c0_71 = arith.constant 0 : index
      %c0_72 = arith.constant 0 : index
      %119 = vector.load %arg8[%c0_71, %c0_72] : memref<32x128xf32, #tpu.memory_space<vmem>>, vector<32x128xf32>
      tpu.vector_store %arg8[%c0_71, %c0_72], %118 {strides = array<i32>} : memref<32x128xf32, #tpu.memory_space<vmem>>, vector<32x128xf32>,
      %cst_73 = arith.constant 0.000000e+00 : f32
      %120 = vector.broadcast %cst_73 : f32 to vector<32x128xf32>
      %c0_74 = arith.constant 0 : index
      %c0_75 = arith.constant 0 : index
      %121 = vector.load %arg9[%c0_74, %c0_75] : memref<32x128xf32, #tpu.memory_space<vmem>>, vector<32x128xf32>
      tpu.vector_store %arg9[%c0_74, %c0_75], %120 {strides = array<i32>} : memref<32x128xf32, #tpu.memory_space<vmem>>, vector<32x128xf32>,
    } else {
    }
    %c0 = arith.constant 0 : index
    %c0_1 = arith.constant 0 : index
    %3 = vector.load %arg3[%c0, %c0_1] : memref<32x128xf32, #tpu.memory_space<vmem>>, vector<32x128xf32>
    %c0_2 = arith.constant 0 : index
    %c0_3 = arith.constant 0 : index
    %c0_4 = arith.constant 0 : index
    %4 = vector.load %arg4[%c0_2, %c0_3, %c0_4] : memref<1x32x128xf32, #tpu.memory_space<vmem>>, vector<1x32x128xf32>
    %5 = vector.shape_cast %4 : vector<1x32x128xf32> to vector<32x128xf32>
    %c0_5 = arith.constant 0 : index
    %c0_6 = arith.constant 0 : index
    %c0_7 = arith.constant 0 : index
    %6 = vector.load %arg7[%c0_5, %c0_6, %c0_7] : memref<3x32x128xf32, #tpu.memory_space<vmem>>, vector<1x32x128xf32>
    %7 = vector.shape_cast %6 : vector<1x32x128xf32> to vector<32x128xf32>
    %c1 = arith.constant 1 : index
    %c0_8 = arith.constant 0 : index
    %c0_9 = arith.constant 0 : index
    %8 = vector.load %arg7[%c1, %c0_8, %c0_9] : memref<3x32x128xf32, #tpu.memory_space<vmem>>, vector<1x32x128xf32>
    %9 = vector.shape_cast %8 : vector<1x32x128xf32> to vector<32x128xf32>
    %c2 = arith.constant 2 : index
    %c0_10 = arith.constant 0 : index
    %c0_11 = arith.constant 0 : index
    %10 = vector.load %arg7[%c2, %c0_10, %c0_11] : memref<3x32x128xf32, #tpu.memory_space<vmem>>, vector<1x32x128xf32>
    %11 = vector.shape_cast %10 : vector<1x32x128xf32> to vector<32x128xf32>
    %12 = arith.index_cast %arg0 : i32 to index
    %c0_12 = arith.constant 0 : index
    %13 = memref.load %arg2[%12, %c0_12] : memref<4x3xf32, #tpu.memory_space<smem>>
    %14 = arith.index_cast %arg0 : i32 to index
    %c1_13 = arith.constant 1 : index
    %15 = memref.load %arg2[%14, %c1_13] : memref<4x3xf32, #tpu.memory_space<smem>>
    %16 = arith.index_cast %arg0 : i32 to index
    %c2_14 = arith.constant 2 : index
    %17 = memref.load %arg2[%16, %c2_14] : memref<4x3xf32, #tpu.memory_space<smem>>
    %18 = vector.broadcast %13 : f32 to vector<32x128xf32>
    %19 = arith.mulf %18, %7 : vector<32x128xf32>
    %20 = vector.broadcast %15 : f32 to vector<32x128xf32>
    %21 = arith.mulf %20, %9 : vector<32x128xf32>
    %22 = arith.addf %19, %21 : vector<32x128xf32>
    %23 = vector.broadcast %17 : f32 to vector<32x128xf32>
    %24 = arith.mulf %23, %11 : vector<32x128xf32>
    %25 = arith.addf %22, %24 : vector<32x128xf32>
    %26 = arith.mulf %25, %3 : vector<32x128xf32>
    %27 = arith.mulf %26, %5 : vector<32x128xf32>
    %28 = vector.shape_cast %27 : vector<32x128xf32> to vector<1x32x128xf32>
    %cst = arith.constant dense<0.000000e+00> : vector<1xf32>
    %29 = vector.multi_reduction <add>, %28, %cst [1, 2] : vector<1x32x128xf32> to vector<1xf32>
    %30 = vector.shape_cast %29 : vector<1xf32> to vector<1x1x1xf32>
    %31 = vector.extract %30[0, 0, 0] : f32 from vector<1x1x1xf32>
    %32 = vector.shape_cast %5 : vector<32x128xf32> to vector<1x32x128xf32>
    %cst_15 = arith.constant dense<0.000000e+00> : vector<1xf32>
    %33 = vector.multi_reduction <add>, %32, %cst_15 [1, 2] : vector<1x32x128xf32> to vector<1xf32>
    %34 = vector.shape_cast %33 : vector<1xf32> to vector<1x1x1xf32>
    %35 = vector.extract %34[0, 0, 0] : f32 from vector<1x1x1xf32>
    %cst_16 = arith.constant 1.000000e-10 : f32
    %36 = arith.maximumf %35, %cst_16 : f32
    %37 = arith.divf %31, %36 : f32
    %cst_17 = arith.constant 1.000000e-10 : f32
    %38 = vector.broadcast %cst_17 : f32 to vector<32x128xf32>
    %39 = arith.addf %25, %38 : vector<32x128xf32>
    %40 = vector.broadcast %37 : f32 to vector<32x128xf32>
    %41 = arith.divf %40, %39 : vector<32x128xf32>
    %42 = arith.mulf %41, %5 : vector<32x128xf32>
    %cst_18 = arith.constant 9.99999974E-5 : f32
    %43 = vector.broadcast %cst_18 : f32 to vector<32x128xf32>
    %44 = arith.cmpf olt, %42, %43 : vector<32x128xf32>
    %cst_19 = arith.constant 1.000000e+04 : f32
    %45 = vector.broadcast %cst_19 : f32 to vector<32x128xf32>
    %46 = arith.select %44, %45, %42 : vector<32x128xi1>, vector<32x128xf32>
    %c0_20 = arith.constant 0 : index
    %c0_21 = arith.constant 0 : index
    %47 = vector.load %arg8[%c0_20, %c0_21] : memref<32x128xf32, #tpu.memory_space<vmem>>, vector<32x128xf32>
    %48 = arith.minimumf %47, %46 : vector<32x128xf32>
    %c0_22 = arith.constant 0 : index
    %c0_23 = arith.constant 0 : index
    %49 = vector.load %arg8[%c0_22, %c0_23] : memref<32x128xf32, #tpu.memory_space<vmem>>, vector<32x128xf32>
    tpu.vector_store %arg8[%c0_22, %c0_23], %48 {strides = array<i32>} : memref<32x128xf32, #tpu.memory_space<vmem>>, vector<32x128xf32>,
    %c0_24 = arith.constant 0 : index
    %c0_25 = arith.constant 0 : index
    %50 = vector.load %arg9[%c0_24, %c0_25] : memref<32x128xf32, #tpu.memory_space<vmem>>, vector<32x128xf32>
    %51 = arith.addf %50, %5 : vector<32x128xf32>
    %c0_26 = arith.constant 0 : index
    %c0_27 = arith.constant 0 : index
    %52 = vector.load %arg9[%c0_26, %c0_27] : memref<32x128xf32, #tpu.memory_space<vmem>>, vector<32x128xf32>
    tpu.vector_store %arg9[%c0_26, %c0_27], %51 {strides = array<i32>} : memref<32x128xf32, #tpu.memory_space<vmem>>, vector<32x128xf32>,
    %cst_28 = arith.constant 1.000000e-01 : f32
    %cst_29 = arith.constant 1.000000e+01 : f32
    %53 = vector.broadcast %cst_28 : f32 to vector<32x128xf32>
    %54 = arith.maximumf %53, %46 : vector<32x128xf32>
    %55 = vector.broadcast %cst_29 : f32 to vector<32x128xf32>
    %56 = arith.minimumf %55, %54 : vector<32x128xf32>
    %57 = arith.mulf %56, %7 : vector<32x128xf32>
    %58 = arith.truncf %57 : vector<32x128xf32> to vector<32x128xbf16>
    %c0_30 = arith.constant 0 : index
    %c0_31 = arith.constant 0 : index
    %c0_32 = arith.constant 0 : index
    %c0_33 = arith.constant 0 : index
    %59 = vector.load %arg6[%c0_30, %c0_31, %c0_32, %c0_33] : memref<1x3x32x128xbf16, #tpu.memory_space<vmem>>, vector<1x1x32x128xbf16>
    %60 = vector.shape_cast %59 : vector<1x1x32x128xbf16> to vector<32x128xbf16>
    %61 = vector.shape_cast %58 : vector<32x128xbf16> to vector<1x1x32x128xbf16>
    tpu.vector_store %arg6[%c0_30, %c0_31, %c0_32, %c0_33], %61 {strides = array<i32>} : memref<1x3x32x128xbf16, #tpu.memory_space<vmem>>, vector<1x1x32x128xbf16>,
    %62 = arith.mulf %56, %9 : vector<32x128xf32>
    %63 = arith.truncf %62 : vector<32x128xf32> to vector<32x128xbf16>
    %c0_34 = arith.constant 0 : index
    %c1_35 = arith.constant 1 : index
    %c0_36 = arith.constant 0 : index
    %c0_37 = arith.constant 0 : index
    %64 = vector.load %arg6[%c0_34, %c1_35, %c0_36, %c0_37] : memref<1x3x32x128xbf16, #tpu.memory_space<vmem>>, vector<1x1x32x128xbf16>
    %65 = vector.shape_cast %64 : vector<1x1x32x128xbf16> to vector<32x128xbf16>
    %66 = vector.shape_cast %63 : vector<32x128xbf16> to vector<1x1x32x128xbf16>
    tpu.vector_store %arg6[%c0_34, %c1_35, %c0_36, %c0_37], %66 {strides = array<i32>} : memref<1x3x32x128xbf16, #tpu.memory_space<vmem>>, vector<1x1x32x128xbf16>,
    %67 = arith.mulf %56, %11 : vector<32x128xf32>
    %68 = arith.truncf %67 : vector<32x128xf32> to vector<32x128xbf16>
    %c0_38 = arith.constant 0 : index
    %c2_39 = arith.constant 2 : index
    %c0_40 = arith.constant 0 : index
    %c0_41 = arith.constant 0 : index
    %69 = vector.load %arg6[%c0_38, %c2_39, %c0_40, %c0_41] : memref<1x3x32x128xbf16, #tpu.memory_space<vmem>>, vector<1x1x32x128xbf16>
    %70 = vector.shape_cast %69 : vector<1x1x32x128xbf16> to vector<32x128xbf16>
    %71 = vector.shape_cast %68 : vector<32x128xbf16> to vector<1x1x32x128xbf16>
    tpu.vector_store %arg6[%c0_38, %c2_39, %c0_40, %c0_41], %71 {strides = array<i32>} : memref<1x3x32x128xbf16, #tpu.memory_space<vmem>>, vector<1x1x32x128xbf16>,
    %c3_i32 = arith.constant 3 : i32
    %72 = arith.cmpi eq, %arg0, %c3_i32 : i32
    %73 = arith.extui %72 : i1 to i32
    %c0_i32_42 = arith.constant 0 : i32
    %74 = arith.cmpi ne, %73, %c0_i32_42 : i32
    scf.if %74 {
      %c0_43 = arith.constant 0 : index
      %c0_44 = arith.constant 0 : index
      %75 = vector.load %arg9[%c0_43, %c0_44] : memref<32x128xf32, #tpu.memory_space<vmem>>, vector<32x128xf32>
      %cst_45 = arith.constant 0.000000e+00 : f32
      %76 = vector.broadcast %cst_45 : f32 to vector<32x128xf32>
      %77 = arith.cmpf ogt, %75, %76 : vector<32x128xf32>
      %c0_46 = arith.constant 0 : index
      %c0_47 = arith.constant 0 : index
      %78 = vector.load %arg8[%c0_46, %c0_47] : memref<32x128xf32, #tpu.memory_space<vmem>>, vector<32x128xf32>
      %79 = arith.select %77, %78, %3 : vector<32x128xi1>, vector<32x128xf32>
      %cst_48 = arith.constant 1.000000e-01 : f32
      %cst_49 = arith.constant 1.000000e+01 : f32
      %80 = vector.broadcast %cst_48 : f32 to vector<32x128xf32>
      %81 = arith.maximumf %80, %79 : vector<32x128xf32>
      %82 = vector.broadcast %cst_49 : f32 to vector<32x128xf32>
      %83 = arith.minimumf %82, %81 : vector<32x128xf32>
      %c0_50 = arith.constant 0 : index
      %c0_51 = arith.constant 0 : index
      %84 = vector.load %arg5[%c0_50, %c0_51] : memref<32x128xf32, #tpu.memory_space<vmem>>, vector<32x128xf32>
      tpu.vector_store %arg5[%c0_50, %c0_51], %83 {strides = array<i32>} : memref<32x128xf32, #tpu.memory_space<vmem>>, vector<32x128xf32>,
    } else {
    }
    return
  }
  func.func @transform_0(%arg0: i32) -> (i32, i32) {
    %c0_i32 = arith.constant 0 : i32
    %c0_i32_0 = arith.constant 0 : i32
    %c0_i32_1 = arith.constant 0 : i32
    return %c0_i32, %c0_i32_0 : i32, i32
  }
  func.func @transform_1(%arg0: i32) -> (i32, i32) {
    %c0_i32 = arith.constant 0 : i32
    %c0_i32_0 = arith.constant 0 : i32
    %c0_i32_1 = arith.constant 0 : i32
    return %c0_i32, %c0_i32_0 : i32, i32
  }
  func.func @transform_2(%arg0: i32) -> (i32, i32) {
    %c0_i32 = arith.constant 0 : i32
    %c0_i32_0 = arith.constant 0 : i32
    %c0_i32_1 = arith.constant 0 : i32
    return %c0_i32, %c0_i32_0 : i32, i32
  }
  func.func @transform_3(%arg0: i32) -> (i32, i32, i32) {
    %c0_i32 = arith.constant 0 : i32
    %c0_i32_0 = arith.constant 0 : i32
    %c0_i32_1 = arith.constant 0 : i32
    return %arg0, %c0_i32, %c0_i32_0 : i32, i32, i32
  }
  func.func @transform_4(%arg0: i32) -> (i32, i32) {
    %c0_i32 = arith.constant 0 : i32
    %c0_i32_0 = arith.constant 0 : i32
    %c0_i32_1 = arith.constant 0 : i32
    return %c0_i32, %c0_i32_0 : i32, i32
  }
  func.func @transform_5(%arg0: i32) -> (i32, i32, i32, i32) {
    %c0_i32 = arith.constant 0 : i32
    %c0_i32_0 = arith.constant 0 : i32
    %c0_i32_1 = arith.constant 0 : i32
    %c0_i32_2 = arith.constant 0 : i32
    return %arg0, %c0_i32, %c0_i32_0, %c0_i32_1 : i32, i32, i32, i32
  }
}

</mosaic_0001>

<bundles_post_ra>
// kernel: tpu_custom_call.1
= control target key start
LH: loop header
LB: loop body
LE: loop exit
PB: predicated region body
PF: predicated region fallthrough
CT: control target
= control target key end

     0   :  { %11 = vsyncpa [#allocation8], 0  ;;  %s1617_s0 = inlined_call_operand.hbm [shape: f32[3,3], index: 0, kind: input, shape index: {}]   ;;  %s1618_s1 = inlined_call_operand.hbm [shape: f32[4,3], index: 1, kind: input, shape index: {}]   ;;  %s1619_s2 = inlined_call_operand.hbm [shape: f32[32,128], index: 2, kind: input, shape index: {}]   ;;  %s1620_s3 = inlined_call_operand.hbm [shape: f32[4,32,128], index: 3, kind: input, shape index: {}]   ;;  %s1621_s4 = inlined_call_operand.hbm [shape: f32[32,128], index: 4, kind: output, shape index: {0}]   ;;  %s1622_s5 = inlined_call_operand.hbm [shape: bf16[4,3,32,128], index: 5, kind: output, shape index: {1}]  }
   0x1   :  { %12 = vsyncpa [#allocation10], 0 }
   0x2   :  { %13 = vsyncpa [#allocation6], 0 }
   0x3   :  { %14 = vsyncpa [#allocation13], 0 }
   0x4   :  { %16 = vsyncpa [#allocation13 + $0x1], 0 }
   0x5   :  { %17 = vsyncpa [#allocation7], 0 }
   0x6   :  { %18 = vsyncpa [#allocation16], 0 }
   0x7   :  { %20 = vsyncpa [#allocation16 + $0x1], 0  ;;  %s1221_s18 = smov 0   ;;  %s1223_s19 = smov 0  }
   0x8   :  { %s1225_s20 = smov 0   ;;  %s1227_s21 = smov 0  }
   0x9 LB: > { %s1242_s22 = sadd.s32 4294967295, %s1174_s21   ;;  %s773_s23 = sadd.s32 4294967294, %s1174_s21   ;;  %s1174_s21 = sphi %s1227_s21, %s1651_s21   ;;  %s1170_s20 = sphi %s1225_s20, %s1650_s20   ;;  %s1166_s19 = sphi %s1223_s19, %s1649_s19   ;;  %s1162_s18 = sphi %s1221_s18, %s1648_s18  }
   0xa   : > { %p109_p0 = scmp.ne.s32.totalorder %s1166_s19, %s1162_s18  ;;  %p1623_p1 = scmp.eq.s32.totalorder %s1242_s22, 0 }
   0xb   : > { %p160_p3 = scmp.eq.s32.totalorder %s773_s23, 3  ;;  %p774_p5 = scmp.ge.s32.totalorder %s1174_s21, 1 }
   0xc   : > { %p1251_p4 = por %p1623_p1, %p109_p0  ;;  %p167_p7 = scmp.lt.s32.totalorder %s1174_s21, 5 }
   0xd   : > { %p1256_p6 = por %p160_p3, %p109_p0  ;;  %s1176_s27 = smov [#allocation11]  }
   0xe   : > { %s1626_s24 = scalar_select %p1251_p4, 1, 0 }
   0xf   : > { %s1627_s25 = scalar_select %p1256_p6, 1, 0 }
  0x10   : > { %p1262_p9 = pnand %p774_p5, %p167_p7  ;;  %s197_s28 = sshll.u32 %s1176_s27, 4  ;;  %s1268_s28 = int_to_ptr.vmem [resolvable:$true] %s197_s28 }
  0x11   : > { %s1277_s30 = sadd.s32 1, %s1174_s21   ;;  %s982_s8 = scalar_lea.hbm %s1617_s0, 64 }
  0x12   : > { %p899_p10 = pneg %p1262_p9  ;;  %p983_p12 = scmp.ne.s32.totalorder %s1617_s0, %s982_s8 }
  0x13   : > { %p989_p5 = scmp.lt.u32.totalorder %s982_s8, %s1617_s0 }
  0x14   : > { %p1272_p11 = pnand %p899_p10, %p1623_p1 }
  0x16   : > { %p984_p13 = pneg %p1272_p11 }
  0x18   : > { %p985_p0 = pnand %p984_p13, %p983_p12 }
  0x1a   : > { %p986_p3 = pneg %p985_p0 }
  0x1c   : > { %p991_p7 = pnand %p989_p5, %p986_p3 }
  0x1e   : > { %994 = shalt.err (!%p991_p7)
}
  0x1f   : > { %s1177_s13 = smov [#allocation5]   ;;  %s995_s23 = scalar_lea.hbm %s1618_s1, 64 }
  0x20   : > { %902 = dma.hbm_to_smem (!%p1272_p11), %s1617_s0, 64, %s1177_s13, [#allocation8]  }
  0x21   : > { %p996_p10 = scmp.ne.s32.totalorder %s1618_s1, %s995_s23  ;;  %p1002_p3 = scmp.lt.u32.totalorder %s995_s23, %s1618_s1 }
  0x23   : > { %p998_p12 = pnand %p996_p10, %p984_p13 }
  0x25   : > { %p999_p0 = pneg %p998_p12 }
  0x27   : > { %p1004_p5 = pnand %p1002_p3, %p999_p0 }
  0x29   : > { %1007 = shalt.err (!%p1004_p5)
}
  0x2a   : > { %s1178_s9 = smov [#allocation9]   ;;  %s1008_s14 = scalar_lea.hbm %s1619_s2, 512 }
  0x2b   : > { %905 = dma.hbm_to_smem (!%p1272_p11), %s1618_s1, 64, %s1178_s9, [#allocation10]  }
  0x2c   : > { %p1009_p7 = scmp.ne.s32.totalorder %s1619_s2, %s1008_s14  ;;  %p1015_p0 = scmp.lt.u32.totalorder %s1008_s14, %s1619_s2 }
  0x2e   : > { %p1011_p10 = pnand %p1009_p7, %p984_p13 }
  0x30   : > { %p1012_p12 = pneg %p1011_p10 }
  0x32   : > { %p1017_p3 = pnand %p1015_p0, %p1012_p12 }
  0x34   : > { %1020 = shalt.err (!%p1017_p3)
}
  0x35   : > { %s1021_s27 = scalar_lea.vmem %s1268_s28, 512  ;;  %p1029_p2 = scmp.lt.s32.totalorder %s1268_s28, %s1268_s28 }
  0x36   : > { %p1022_p5 = scmp.ne.s32.totalorder %s1268_s28, %s1021_s27  ;;  %p1030_p7 = scmp.lt.s32.totalorder %s1021_s27, %s1021_s27 }
  0x38   : > { %p1024_p8 = pnand %p1022_p5, %p984_p13  ;;  %p1031_p10 = por %p1030_p7, %p1029_p2 }
  0x3a   : > { %p1025_p1 = pneg %p1024_p8 }
  0x3c   : > { %p1032_p6 = pnand %p1031_p10, %p1025_p1 }
  0x3e   : > { %1035 = shalt.err (!%p1032_p6)
}
  0x3f   : > { %s1179_s6 = smov 128   ;;  %s1180_s7 = smov 8  }
  0x40   : > { %908 = dma.hbm_to_vmem [thread:$0]  (!%p1272_p11), %s1619_s2, 512, %s1268_s28, [#allocation6], %s1179_s6, %s1179_s6, %s1180_s7  }
  0x41   : > { %s93_s10 = ssub.s32 %s1174_s21, %s1277_s30  ;;  %s96_s11 = sadd.s32 1, %s1170_s20 }
  0x42   : > { %p94_p1 = scmp.eq.s32.totalorder %s93_s10, 0  ;;  %p103_p2 = scmp.ne.s32.totalorder %s1170_s20, %s1166_s19 }
  0x43   : > { %p104_p6 = scmp.eq.s32.totalorder %s1174_s21, 0  ;;  %p920_p8 = scmp.lt.s32.totalorder %s1174_s21, 4 }
  0x44   : > { %s1351_s12 = scalar_select %p94_p1, %s1170_s20, %s96_s11  }
  0x45   : > { %p105_p13 = por %p104_p6, %p103_p2  ;;  %p1630_p12 = scmp.eq.s32.totalorder %s1242_s22, 3 }
  0x46   : > { %s211_s29 = sand.u32 1, %s1170_s20   ;;  %s823_s14 = sshll.u32 %s1174_s21, 9 }
  0x47   : > { %p1355_p0 = por %p1630_p12, %p103_p2  ;;  %s779_s15 = sshll.u32 %s211_s29, 5 }
  0x48   : > { %s1364_s28 = scalar_lea.hbm %s1620_s3, %s823_s14  ;;  %s215_s23 = scalar_lea.vmem [#allocation12], %s779_s15 }
  0x49   : > { %s1631_s13 = scalar_select %p1355_p0, 1, 0 }
  0x4a   : > { %s222_s27 = sshll.u32 %s215_s23, 4  ;;  %p1366_p11 = pnand %p920_p8, %p105_p13  ;;  %s1370_s27 = int_to_ptr.vmem [resolvable:$true] %s222_s27 }
  0x4b   : > { %s1372_s9 = scalar_lea.sflag [#allocation13], %s211_s29  ;;  %s1036_s10 = scalar_lea.hbm %s1364_s28, 512 }
  0x4c   : > { %p1037_p3 = scmp.ne.s32.totalorder %s1364_s28, %s1036_s10  ;;  %p1038_p5 = pneg %p1366_p11 }
  0x4d   : > { %s1041_s15 = scalar_lea.hbm %s1620_s3, 2048  ;;  %p1042_p1 = scmp.lt.u32.totalorder %s1364_s28, %s1620_s3 }
  0x4e   : > { %p1039_p7 = pnand %p1038_p5, %p1037_p3  ;;  %p1043_p2 = scmp.lt.u32.totalorder %s1041_s15, %s1036_s10 }
  0x4f   : > { %p1045_p8 = scmp.lt.u32.totalorder %s1036_s10, %s1364_s28 }
  0x50   : > { %p1040_p10 = pneg %p1039_p7  ;;  %p1044_p6 = por %p1043_p2, %p1042_p1 }
  0x52   : > { %p1046_p13 = por %p1045_p8, %p1044_p6 }
  0x54   : > { %p1047_p12 = pnand %p1046_p13, %p1040_p10 }
  0x56   : > { %1050 = shalt.err (!%p1047_p12)
}
  0x57   : > { %s1051_s29 = scalar_lea.vmem %s1370_s27, 512  ;;  %s1181_s23 = smov [#allocation12]  }
  0x58   : > { %p1052_p3 = scmp.ne.s32.totalorder %s1370_s27, %s1051_s29  ;;  %s1056_s11 = sshll.u32 %s1181_s23, 4  ;;  %s1057_s11 = int_to_ptr.vmem [resolvable:$false] %s1056_s11 }
  0x59   : > { %s1058_s14 = scalar_lea.vmem %s1057_s11, 1024  ;;  %p1059_p4 = scmp.lt.s32.totalorder %s1370_s27, %s1057_s11 }
  0x5a   : > { %p1054_p7 = pnand %p1052_p3, %p1038_p5  ;;  %p1060_p1 = scmp.lt.s32.totalorder %s1058_s14, %s1051_s29 }
  0x5c   : > { %p1055_p0 = pneg %p1054_p7  ;;  %p1061_p2 = por %p1060_p1, %p1059_p4 }
  0x5e   : > { %p1062_p6 = pnand %p1061_p2, %p1055_p0 }
  0x60   : > { %1065 = shalt.err (!%p1062_p6)
}
  0x61   : > { %912 = dma.hbm_to_vmem [thread:$0]  (!%p1366_p11), %s1364_s28, 512, %s1370_s27, %s1372_s9, %s1179_s6, %s1179_s6, %s1180_s7  }
  0x62   : > { %234 = sbr.rel (%p1262_p9) target bundleno = 522 (0x20a), region = 36  ;;  %p1633_p5 = scmp.eq.s32.totalorder (!%p1262_p9), %s1242_s22, 0 }
  0x69   : > { %1137 = dma.done.wait (%p1633_p5), [#allocation8], 64   ;;  %p1634_p10 = pmov %p1633_p5 }
  0x6a   : > { %p1635_p4 = pmov %p1633_p5 }
  0x6b   : > { %1139 = vsyncadd (%p1634_p10), [#allocation8], 4294967232 }
  0x6c   : > { %1141 = dma.done.wait (%p1635_p4), [#allocation10], 64   ;;  %p1636_p0 = pmov %p1635_p4 }
  0x6e   : > { %1143 = vsyncadd (%p1636_p0), [#allocation10], 4294967232  ;;  %p1637_p8 = pmov %p1636_p0 }
  0x6f   : > { %p1638_p11 = pmov %p1636_p0 }
  0x70   : > { %1145 = dma.done.wait (%p1637_p8), [#allocation6], 512  }
  0x71   : > { %1147 = vsyncadd (%p1638_p11), [#allocation6], 4294966784  ;;  %s1418_s26 = sand.u32 1, %s1166_s19   ;;  %p1639_p9 = scmp.ne.s32.totalorder %s1626_s24, 0 }
  0x72   : > { %s786_s6 = sshll.u32 %s1418_s26, 5  ;;  %s249_s7 = scalar_lea.sflag [#allocation13], %s1418_s26 }
  0x73   : > { %s1422_s28 = scalar_lea.vmem [#allocation12], %s786_s6 }
  0x74   : > { %1149 = dma.done.wait (%p1639_p9), %s249_s7, 512  }
  0x75   : > { %1151 = vsyncadd (%p1639_p9), %s249_s7, 4294966784 }
  0x76   : > { %257 = sfence }
  0x77   : > { %s871_s27 = smul.u32 48, %s1418_s26  ;;  %p1640_p13 = scmp.ne.s32.totalorder %s1242_s22, 0 }
  0x78   : > { %v284_v0 = vlaneseq (!%p1640_p13)  ;;  %s296_s9 = sld [smem:[#allocation5]] (!%p1640_p13)  ;;  %s788_s10 = sld [smem:[#allocation5 + $0x1]] (!%p1640_p13)  ;;  %v1182_v1 = vmov (!%p1640_p13), inf   ;;  %v1183_v2 = vmov (!%p1640_p13), 0.0  }
  0x79   : > { %s1429_s8 = scalar_lea.vmem [#allocation15], %s871_s27  ;;  %283 = sbr.rel (%p1640_p13) target bundleno = 143 (0x8f), region = 56  ;;  %367 = vst [vmem:[#allocation3] sm:$0xff] (!%p1640_p13), %v1182_v1  ;;  %368 = vst [vmem:[#allocation3 + $0x8] sm:$0xff] (!%p1640_p13), %v1182_v1 }
  0x7a   : > { %s789_s15 = sld [smem:[#allocation5 + $0x2]] (!%p1640_p13)  ;;  %s1433_s16 = sld [smem:[#allocation5 + $0x80]] (!%p1640_p13)  ;;  %369 = vst [vmem:[#allocation3 + $0x10] sm:$0xff] (!%p1640_p13), %v1182_v1  ;;  %370 = vst [vmem:[#allocation3 + $0x18] sm:$0xff] (!%p1640_p13), %v1182_v1  ;;  %v285_v3 = vand.u32 (!%p1640_p13), 127, %v284_v0  ;;  %v288_v4 = vshrl.u32 (!%p1640_p13), %v284_v0, 7 }
  0x7b   : > { %371 = vst [vmem:[#allocation4] sm:$0xff] (!%p1640_p13), %v1183_v2  ;;  %372 = vst [vmem:[#allocation4 + $0x8] sm:$0xff] (!%p1640_p13), %v1183_v2  ;;  %s791_s24 = sld [smem:[#allocation5 + $0x81]] (!%p1640_p13)  ;;  %s792_s17 = sld [smem:[#allocation5 + $0x82]] (!%p1640_p13) }
  0x7c   : > { %373 = vst [vmem:[#allocation4 + $0x10] sm:$0xff] (!%p1640_p13), %v1183_v2  ;;  %374 = vst [vmem:[#allocation4 + $0x18] sm:$0xff] (!%p1640_p13), %v1183_v2  ;;  %v286_v5 = vcvt.s32.f32 (!%p1640_p13), %v285_v3  ;;  %v292_v6 = vcvt.s32.f32 (!%p1640_p13), %v288_v4  ;;  %v289_v7 = vadd.s32 (!%p1640_p13), 8, %v288_v4  ;;  %v290_v8 = vadd.s32 (!%p1640_p13), 16, %v288_v4  ;;  %s1435_s29 = sld [smem:[#allocation5 + $0x100]] (!%p1640_p13)  ;;  %s1437_s23 = sld [smem:[#allocation5 + $0x101]] (!%p1640_p13) }
  0x7d   : > { %v291_v9 = vadd.s32 (!%p1640_p13), 24, %v288_v4  ;;  %s1440_s11 = sld [smem:[#allocation5 + $0x102]] (!%p1640_p13) }
  0x7e   : > { %v297_v10 = vstv (!%p1640_p13), %s296_s9  ;;  %v300_v11 = vstv (!%p1640_p13), %s788_s10  ;;  %v293_v12 = vcvt.s32.f32 (!%p1640_p13), %v289_v7  ;;  %v294_v13 = vcvt.s32.f32 (!%p1640_p13), %v290_v8 }
  0x7f   : > { %v298_v14 = vmul.f32 (!%p1640_p13), %v297_v10, %v286_v5  ;;  %v301_v15 = vmul.f32 (!%p1640_p13), %v300_v11, %v292_v6  ;;  %v295_v17 = vcvt.s32.f32 (!%p1640_p13), %v291_v9 }
  0x80   : > { %v310_v16 = vstv %s789_s15  ;;  %v302_v18 = vmul.f32 %v300_v11, %v293_v12  ;;  %v303_v19 = vmul.f32 %v300_v11, %v294_v13  ;;  %v320_v20 = vstv %s1433_s16 }
  0x81   : > { %v323_v21 = vstv %s791_s24  ;;  %v305_v22 = vadd.f32 %v301_v15, %v298_v14  ;;  %v304_v23 = vmul.f32 %v300_v11, %v295_v17  ;;  %v321_v24 = vmul.f32 %v320_v20, %v286_v5 }
  0x82   : > { %v324_v25 = vmul.f32 %v323_v21, %v292_v6  ;;  %v306_v26 = vadd.f32 %v302_v18, %v298_v14  ;;  %v307_v27 = vadd.f32 %v303_v19, %v298_v14  ;;  %v333_v28 = vstv %s792_s17 }
  0x83   : > { %v325_v29 = vmul.f32 %v323_v21, %v293_v12  ;;  %v311_v30 = vadd.f32 %v310_v16, %v305_v22  ;;  %v308_v31 = vadd.f32 %v304_v23, %v298_v14  ;;  %v326_v33 = vmul.f32 %v323_v21, %v294_v13 }
  0x84   : > { %v328_v32 = vadd.f32 %v324_v25, %v321_v24  ;;  %v312_v34 = vadd.f32 %v310_v16, %v306_v26  ;;  %v313_v35 = vadd.f32 %v310_v16, %v307_v27  ;;  %v327_v37 = vmul.f32 %v323_v21, %v295_v17 }
  0x85   : > { %v329_v36 = vadd.f32 %v325_v29, %v321_v24  ;;  %315 = vst [vmem:[#allocation2] sm:$0xff] %v311_v30  ;;  %v314_v38 = vadd.f32 %v310_v16, %v308_v31  ;;  %v330_v40 = vadd.f32 %v326_v33, %v321_v24  ;;  %v344_v41 = vstv %s1435_s29 }
  0x86   : > { %v334_v39 = vadd.f32 %v333_v28, %v328_v32  ;;  %316 = vst [vmem:[#allocation2 + $0x8] sm:$0xff] %v312_v34  ;;  %317 = vst [vmem:[#allocation2 + $0x10] sm:$0xff] %v313_v35  ;;  %v331_v43 = vadd.f32 %v327_v37, %v321_v24  ;;  %v345_v44 = vmul.f32 %v344_v41, %v286_v5  ;;  %v347_v45 = vstv %s1437_s23 }
  0x87   : > { %v335_v42 = vadd.f32 %v333_v28, %v329_v36  ;;  %318 = vst [vmem:[#allocation2 + $0x18] sm:$0xff] %v314_v38  ;;  %v336_v46 = vadd.f32 %v333_v28, %v330_v40  ;;  %v348_v47 = vmul.f32 %v347_v45, %v292_v6  ;;  %v349_v48 = vmul.f32 %v347_v45, %v293_v12 }
  0x88   : > { %339 = vst [vmem:[#allocation2 + $0x20] sm:$0xff] %v334_v39  ;;  %v337_v49 = vadd.f32 %v333_v28, %v331_v43  ;;  %v357_v50 = vstv %s1440_s11  ;;  %v350_v51 = vmul.f32 %v347_v45, %v294_v13  ;;  %v351_v52 = vmul.f32 %v347_v45, %v295_v17 }
  0x89   : > { %340 = vst [vmem:[#allocation2 + $0x28] sm:$0xff] %v335_v42  ;;  %341 = vst [vmem:[#allocation2 + $0x30] sm:$0xff] %v336_v46  ;;  %v352_v53 = vadd.f32 %v348_v47, %v345_v44  ;;  %v353_v54 = vadd.f32 %v349_v48, %v345_v44 }
  0x8a   : > { %342 = vst [vmem:[#allocation2 + $0x38] sm:$0xff] %v337_v49  ;;  %v354_v55 = vadd.f32 %v350_v51, %v345_v44  ;;  %v355_v56 = vadd.f32 %v351_v52, %v345_v44 }
  0x8b   : > { %v358_v57 = vadd.f32 %v357_v50, %v352_v53  ;;  %v359_v58 = vadd.f32 %v357_v50, %v353_v54 }
  0x8c   : > { %v360_v59 = vadd.f32 %v357_v50, %v354_v55  ;;  %v361_v60 = vadd.f32 %v357_v50, %v355_v56 }
  0x8d   : > { %363 = vst [vmem:[#allocation2 + $0x40] sm:$0xff] %v358_v57  ;;  %364 = vst [vmem:[#allocation2 + $0x48] sm:$0xff] %v359_v58 }
  0x8e   : > { %365 = vst [vmem:[#allocation2 + $0x50] sm:$0xff] %v360_v59  ;;  %366 = vst [vmem:[#allocation2 + $0x58] sm:$0xff] %v361_v60 }
  0x8f PF: > { %s796_s14 = sshll.u32 %s1242_s22, 7  ;;  %v1447_v61 = vld [vmem:[%s1422_s28] sm:$0xff]  ;;  %v1451_v63 = vld [vmem:[#allocation2 + $0x8] sm:$0xff]  ;;  %v1453_v0 = vld [vmem:[#allocation2 + $0x10] sm:$0xff]  ;;  %s1184_s16 = smov 1e-10  }
  0x90   : > { %s398_s6 = sld [smem:[#allocation9 + %s796_s14]]  ;;  %s399_s7 = sadd.s32 1, %s796_s14  ;;  %v1449_v62 = vld [vmem:[#allocation2] sm:$0xff]  ;;  %v1455_v1 = vld [vmem:[#allocation2 + $0x18] sm:$0xff]  ;;  %v1459_v3 = vld [vmem:[#allocation2 + $0x28] sm:$0xff] }
  0x91   : > { %s400_s27 = sld [smem:[#allocation9 + %s399_s7]]  ;;  %s401_s9 = sadd.s32 2, %s796_s14  ;;  %v1457_v2 = vld [vmem:[#allocation2 + $0x20] sm:$0xff]  ;;  %v1462_v4 = vld [vmem:[%s1422_s28 + $0x8] sm:$0xff]  ;;  %v1465_v5 = vld [vmem:[%s1422_s28 + $0x10] sm:$0xff] }
  0x92   : > { %s402_s10 = sld [smem:[#allocation9 + %s401_s9]]  ;;  %v1467_v6 = vld [vmem:[#allocation2 + $0x30] sm:$0xff]  ;;  %v1469_v7 = vld [vmem:[#allocation2 + $0x38] sm:$0xff]  ;;  %v500_v8 = vld [vmem:[#allocation4] sm:$0xff]  ;;  %v446_v55 = vadd.f32 %v1462_v4, %v1447_v61  ;;  %p817_p12 = scmp.ne.s32.totalorder %s1242_s22, 3 }
  0x93   : > { %v501_v11 = vld [vmem:[#allocation4 + $0x8] sm:$0xff]  ;;  %v502_v12 = vld [vmem:[#allocation4 + $0x10] sm:$0xff]  ;;  %v504_v13 = vadd.f32 %v500_v8, %v1447_v61  ;;  %v503_v29 = vld [vmem:[#allocation4 + $0x18] sm:$0xff] }
  0x94   : > { %v1471_v9 = vld [vmem:[#allocation2 + $0x40] sm:$0xff]  ;;  %v1474_v14 = vld [vmem:[#allocation2 + $0x48] sm:$0xff]  ;;  %v505_v23 = vadd.f32 %v501_v11, %v1462_v4  ;;  %v506_v24 = vadd.f32 %v502_v12, %v1465_v5  ;;  %v1497_v35 = vld [vmem:[%s1422_s28 + $0x18] sm:$0xff]  ;;  %v447_v59 = vadd.f32 %v446_v55, %v1465_v5 }
  0x95   : > { %v1476_v15 = vld [vmem:[#allocation2 + $0x50] sm:$0xff]  ;;  %v1478_v16 = vld [vmem:[#allocation2 + $0x58] sm:$0xff]  ;;  %508 = vst [vmem:[#allocation4] sm:$0xff] %v504_v13  ;;  %v1494_v34 = vld [vmem:[#allocation11] sm:$0xff]  ;;  %v507_v43 = vadd.f32 %v503_v29, %v1497_v35 }
  0x96   : > { %v403_v10 = vstv %s398_s6  ;;  %509 = vst [vmem:[#allocation4 + $0x8] sm:$0xff] %v505_v23  ;;  %510 = vst [vmem:[#allocation4 + $0x10] sm:$0xff] %v506_v24  ;;  %v1499_v40 = vld [vmem:[#allocation11 + $0x8] sm:$0xff]  ;;  %v1501_v41 = vld [vmem:[#allocation11 + $0x10] sm:$0xff]  ;;  %v448_v8 = vadd.f32 %v447_v59, %v1497_v35 }
  0x97   : > { %v404_v17 = vmul.f32 %v403_v10, %v1449_v62  ;;  %v405_v18 = vmul.f32 %v403_v10, %v1451_v63  ;;  %v406_v19 = vmul.f32 %v403_v10, %v1453_v0  ;;  %v407_v20 = vmul.f32 %v403_v10, %v1455_v1  ;;  %v1503_v42 = vld [vmem:[#allocation11 + $0x18] sm:$0xff]  ;;  %511 = vst [vmem:[#allocation4 + $0x18] sm:$0xff] %v507_v43 }
  0x98   : > { %v408_v21 = vstv %s400_s27  ;;  %v417_v22 = vstv %s402_s10 }
  0x99   : > { %v409_v25 = vmul.f32 %v408_v21, %v1457_v2  ;;  %v410_v26 = vmul.f32 %v408_v21, %v1459_v3  ;;  %v411_v27 = vmul.f32 %v408_v21, %v1467_v6  ;;  %v412_v28 = vmul.f32 %v408_v21, %v1469_v7 }
  0x9a   : > { %v418_v30 = vmul.f32 %v417_v22, %v1471_v9  ;;  %v419_v31 = vmul.f32 %v417_v22, %v1474_v14  ;;  %v420_v32 = vmul.f32 %v417_v22, %v1476_v15  ;;  %v421_v33 = vmul.f32 %v417_v22, %v1478_v16 }
  0x9b   : > { %v413_v36 = vadd.f32 %v409_v25, %v404_v17  ;;  %v414_v37 = vadd.f32 %v410_v26, %v405_v18  ;;  %v415_v38 = vadd.f32 %v411_v27, %v406_v19  ;;  %v416_v39 = vadd.f32 %v412_v28, %v407_v20 }
  0x9d   : > { %v422_v44 = vadd.f32 %v418_v30, %v413_v36  ;;  %v423_v45 = vadd.f32 %v419_v31, %v414_v37  ;;  %v424_v46 = vadd.f32 %v420_v32, %v415_v38  ;;  %v425_v47 = vadd.f32 %v421_v33, %v416_v39 }
  0x9f   : > { %v426_v48 = vmul.f32 %v422_v44, %v1494_v34  ;;  %v427_v49 = vmul.f32 %v423_v45, %v1499_v40  ;;  %v428_v50 = vmul.f32 %v424_v46, %v1501_v41  ;;  %v429_v51 = vmul.f32 %v425_v47, %v1503_v42 }
  0xa0   : > { %v463_v29 = vadd.f32 1e-10, %v422_v44  ;;  %v464_v30 = vadd.f32 1e-10, %v423_v45  ;;  %v465_v31 = vadd.f32 1e-10, %v424_v46 }
  0xa1   : > { %v430_v52 = vmul.f32 %v426_v48, %v1447_v61  ;;  %v431_v53 = vmul.f32 %v427_v49, %v1462_v4  ;;  %v432_v54 = vmul.f32 %v428_v50, %v1465_v5  ;;  %v433_v56 = vmul.f32 %v429_v51, %v1497_v35  ;;  %v488_v51 = vld [vmem:[#allocation3] sm:$0xff] }
  0xa2   : > { %v466_v32 = vadd.f32 1e-10, %v425_v47 }
  0xa3   : > { %v434_v57 = vadd.f32 %v431_v53, %v430_v52  ;;  %v489_v52 = vld [vmem:[#allocation3 + $0x8] sm:$0xff]  ;;  %v490_v53 = vld [vmem:[#allocation3 + $0x10] sm:$0xff] }
  0xa5   : > { %v435_v58 = vadd.f32 %v434_v57, %v432_v54  ;;  %v491_v54 = vld [vmem:[#allocation3 + $0x18] sm:$0xff] }
  0xa7   : > { %v436_v60 = vadd.f32 %v435_v58, %v433_v56 }
  0xa9   : > { %437 = vadd.xlane.f32.xlu0 %v436_v60 }
  0xad   : > { %449 = vadd.xlane.f32.xlu0 %v448_v8 }
 0x136   : > { %v438_v10 = vpop.xlane.xlu0 %437 }
 0x137   : > { %v439_v11 = vrot.slane %v438_v10, 4 }
 0x139   : > { %v440_v12 = vadd.f32 %v439_v11, %v438_v10 }
 0x13a   : > { %v450_v13 = vpop.xlane.xlu0 %449 }
 0x13b   : > { %v441_v17 = vrot.slane %v440_v12, 2  ;;  %v451_v18 = vrot.slane %v450_v13, 4 }
 0x13d   : > { %v452_v19 = vadd.f32 %v451_v18, %v450_v13  ;;  %v442_v20 = vadd.f32 %v441_v17, %v440_v12 }
 0x13f   : > { %v453_v21 = vrot.slane %v452_v19, 2  ;;  %v443_v22 = vrot.slane %v442_v20, 1 }
 0x141   : > { %v454_v23 = vadd.f32 %v453_v21, %v452_v19  ;;  %v444_v24 = vadd.f32 %v443_v22, %v442_v20 }
 0x143   : > { %872 = vpush %v444_v24  ;;  %v455_v25 = vrot.slane %v454_v23, 1 }
 0x145   : > { %v456_v26 = vadd.f32 %v455_v25, %v454_v23 }
 0x147   : > { %874 = vpush %v456_v26 }
 0x174   : > { %s873_s28 = spop %872 }
 0x178   : > { %s875_s15 = spop %874 }
 0x179   : > { %s458_s24 = smax.f32 %s1184_s16, %s875_s15 }
 0x17a   : > { %v459_v27 = vstv %s458_s24 }
 0x17b   : > { %972 = vrcp.f32 %v459_v27 }
 0x17c   : > { %974 = vrcp.f32 %v463_v29  ;;  %v600_v29 = vld [vmem:[#allocation4 + $0x10] sm:$0xff] (!%p817_p12) }
 0x17d   : > { %976 = vrcp.f32 %v464_v30  ;;  %vm604_vm6 = vcmp.gt.f32.partialorder (!%p817_p12), %v600_v29, 0.0 }
 0x17e   : > { %978 = vrcp.f32 %v465_v31 }
 0x17f   : > { %980 = vrcp.f32 %v466_v32  ;;  %v601_v32 = vld [vmem:[#allocation4 + $0x18] sm:$0xff] (!%p817_p12) }
 0x180   : > { %vm605_vm7 = vcmp.gt.f32.partialorder (!%p817_p12), %v601_v32, 0.0 }
 0x185   : > { %v973_v28 = vpop.eup %972 }
 0x186   : > { %876 = vpush %v973_v28  ;;  %v975_v33 = vpop.eup %974 }
 0x187   : > { %v977_v36 = vpop.eup %976 }
 0x188   : > { %v979_v37 = vpop.eup %978 }
 0x189   : > { %v981_v38 = vpop.eup %980 }
 0x1b7   : > { %s877_s17 = spop %876 }
 0x1b8   : > { %s462_s29 = smul.f32 %s877_s17, %s873_s28 }
 0x1ba   : > { %v467_v39 = vstv %s462_s29 }
 0x1bb   : > { %v469_v43 = vmul.f32 %v975_v33, %v467_v39  ;;  %v471_v48 = vmul.f32 %v977_v36, %v467_v39  ;;  %v473_v49 = vmul.f32 %v979_v37, %v467_v39  ;;  %v475_v50 = vmul.f32 %v981_v38, %v467_v39 }
 0x1bd   : > { %v476_v44 = vmul.f32 %v469_v43, %v1447_v61  ;;  %v477_v45 = vmul.f32 %v471_v48, %v1462_v4  ;;  %v478_v46 = vmul.f32 %v473_v49, %v1465_v5  ;;  %v479_v47 = vmul.f32 %v475_v50, %v1497_v35 }
 0x1bf   : > { %vm480_vm0 = vcmp.lt.f32.partialorder %v476_v44, 0.0001  ;;  %vm481_vm1 = vcmp.lt.f32.partialorder %v477_v45, 0.0001  ;;  %vm482_vm2 = vcmp.lt.f32.partialorder %v478_v46, 0.0001 }
 0x1c0   : > { %vm483_vm3 = vcmp.lt.f32.partialorder %v479_v47, 0.0001  ;;  %v484_v55 = vsel %vm480_vm0, 10000.0, %v476_v44  ;;  %v485_v56 = vsel %vm481_vm1, 10000.0, %v477_v45  ;;  %v486_v57 = vsel %vm482_vm2, 10000.0, %v478_v46 }
 0x1c1   : > { %v487_v58 = vsel %vm483_vm3, 10000.0, %v479_v47  ;;  %v492_v59 = vmin.f32 %v488_v51, %v484_v55  ;;  %v493_v61 = vmin.f32 %v489_v52, %v485_v56  ;;  %v494_v60 = vmin.f32 %v490_v53, %v486_v57 }
 0x1c2   : > { %v495_v4 = vmin.f32 %v491_v54, %v487_v58  ;;  %v512_v8 = vmax.f32 %v484_v55, 0.1  ;;  %v513_v5 = vmax.f32 %v485_v56, 0.1  ;;  %v514_v10 = vmax.f32 %v486_v57, 0.1 }
 0x1c3   : > { %496 = vst [vmem:[#allocation3] sm:$0xff] %v492_v59  ;;  %497 = vst [vmem:[#allocation3 + $0x8] sm:$0xff] %v493_v61  ;;  %v515_v35 = vmax.f32 %v487_v58, 0.1 }
 0x1c4   : > { %498 = vst [vmem:[#allocation3 + $0x10] sm:$0xff] %v494_v60  ;;  %499 = vst [vmem:[#allocation3 + $0x18] sm:$0xff] %v495_v4  ;;  %v516_v11 = vmin.f32 %v512_v8, 10.0  ;;  %v517_v12 = vmin.f32 %v513_v5, 10.0  ;;  %v518_v13 = vmin.f32 %v514_v10, 10.0 }
 0x1c5   : > { %v519_v17 = vmin.f32 %v515_v35, 10.0 }
 0x1c6   : > { %v520_v18 = vmul.f32 %v516_v11, %v1449_v62  ;;  %v521_v19 = vmul.f32 %v517_v12, %v1451_v63  ;;  %v522_v20 = vmul.f32 %v518_v13, %v1453_v0  ;;  %v544_v21 = vmul.f32 %v516_v11, %v1457_v2 }
 0x1c7   : > { %v523_v22 = vmul.f32 %v519_v17, %v1455_v1  ;;  %v545_v23 = vmul.f32 %v517_v12, %v1459_v3  ;;  %v546_v24 = vmul.f32 %v518_v13, %v1467_v6  ;;  %v547_v25 = vmul.f32 %v519_v17, %v1469_v7  ;;  %597 = sbr.rel (%p817_p12) target bundleno = 466 (0x1d2), region = 60  ;;  %v598_v7 = vld [vmem:[#allocation4] sm:$0xff] (!%p817_p12) }
 0x1c8   : > { %v839_v62 = vpack.c.bf16 %v521_v19, %v520_v18  ;;  %v569_v63 = vmul.f32 %v516_v11, %v1471_v9  ;;  %v570_v0 = vmul.f32 %v517_v12, %v1474_v14  ;;  %v571_v26 = vmul.f32 %v518_v13, %v1476_v15  ;;  %v599_v14 = vld [vmem:[#allocation4 + $0x8] sm:$0xff] (!%p817_p12) }
 0x1c9   : > { %v844_v2 = vpack.c.bf16 %v523_v22, %v522_v20  ;;  %v849_v27 = vpack.c.bf16 %v545_v23, %v544_v21  ;;  %v854_v28 = vpack.c.bf16 %v547_v25, %v546_v24  ;;  %v572_v1 = vmul.f32 %v519_v17, %v1478_v16 }
 0x1ca   : > { %840 = vst [vmem:[%s1429_s8] sm:$0xff] %v839_v62   ;;  %v859_v3 = vpack.c.bf16 %v570_v0, %v569_v63  ;;  %v606_v9 = vld [vmem:[#allocation3] sm:$0xff] (!%p817_p12)  ;;  %vm602_vm4 = vcmp.gt.f32.partialorder (!%p817_p12), %v598_v7, 0.0  ;;  %vm603_vm5 = vcmp.gt.f32.partialorder (!%p817_p12), %v599_v14, 0.0  ;;  %v607_v15 = vld [vmem:[#allocation3 + $0x8] sm:$0xff] (!%p817_p12) }
 0x1cb   : > { %866 = vst [vmem:[%s1429_s8 + $0x8] sm:$0xff] %v844_v2   ;;  %867 = vst [vmem:[%s1429_s8 + $0x10] sm:$0xff] %v849_v27   ;;  %v864_v6 = vpack.c.bf16 %v572_v1, %v571_v26  ;;  %v608_v30 = vld [vmem:[#allocation3 + $0x10] sm:$0xff] (!%p817_p12)  ;;  %v610_v16 = vsel (!%p817_p12), %vm602_vm4, %v606_v9, %v1494_v34  ;;  %v611_v31 = vsel (!%p817_p12), %vm603_vm5, %v607_v15, %v1499_v40  ;;  %v609_v33 = vld [vmem:[#allocation3 + $0x18] sm:$0xff] (!%p817_p12) }
 0x1cc   : > { %868 = vst [vmem:[%s1429_s8 + $0x18] sm:$0xff] %v854_v28   ;;  %869 = vst [vmem:[%s1429_s8 + $0x20] sm:$0xff] %v859_v3   ;;  %v614_v36 = vmax.f32 (!%p817_p12), %v610_v16, 0.1  ;;  %v615_v37 = vmax.f32 (!%p817_p12), %v611_v31, 0.1  ;;  %v612_v38 = vsel (!%p817_p12), %vm604_vm6, %v608_v30, %v1501_v41  ;;  %v613_v43 = vsel (!%p817_p12), %vm605_vm7, %v609_v33, %v1503_v42 }
 0x1cd   : > { %870 = vst [vmem:[%s1429_s8 + $0x28] sm:$0xff] %v864_v6   ;;  %v616_v39 = vmax.f32 (!%p817_p12), %v612_v38, 0.1  ;;  %v617_v50 = vmax.f32 (!%p817_p12), %v613_v43, 0.1 }
 0x1ce   : > { %v618_v48 = vmin.f32 %v614_v36, 10.0  ;;  %v619_v49 = vmin.f32 %v615_v37, 10.0 }
 0x1cf   : > { %v620_v44 = vmin.f32 %v616_v39, 10.0  ;;  %v621_v34 = vmin.f32 %v617_v50, 10.0 }
 0x1d0   : > { %622 = vst [vmem:[#allocation14] sm:$0xff] %v618_v48  ;;  %623 = vst [vmem:[#allocation14 + $0x8] sm:$0xff] %v619_v49 }
 0x1d1   : > { %624 = vst [vmem:[#allocation14 + $0x10] sm:$0xff] %v620_v44  ;;  %625 = vst [vmem:[#allocation14 + $0x18] sm:$0xff] %v621_v34 }
 0x1d2 PF: > { %s1185_s23 = smov [#allocation14]   ;;  %p1641_p7 = scmp.eq.s32.totalorder %s1242_s22, 3 }
 0x1d3   : > { %s637_s11 = sshll.u32 %s1185_s23, 4  ;;  %s638_s11 = int_to_ptr.vmem [resolvable:$true] %s637_s11 }
 0x1d4   : > { %s1066_s14 = scalar_lea.vmem %s638_s11, 512  ;;  %p1073_p6 = scmp.lt.s32.totalorder %s638_s11, %s638_s11 }
 0x1d5   : > { %p1067_p3 = scmp.ne.s32.totalorder %s638_s11, %s1066_s14  ;;  %p1074_p5 = scmp.lt.s32.totalorder %s1066_s14, %s1066_s14 }
 0x1d7   : > { %p1068_p1 = pnand %p1067_p3, %p1641_p7  ;;  %p1075_p10 = por %p1074_p5, %p1073_p6 }
 0x1d9   : > { %p1069_p2 = pneg %p1068_p1 }
 0x1db   : > { %p1076_p4 = pnand %p1075_p10, %p1069_p2 }
 0x1dd   : > { %1079 = shalt.err (!%p1076_p4)
}
 0x1de   : > { %s1080_s27 = scalar_lea.hbm %s1621_s4, 512  ;;  %p1642_p8 = pmov %p1641_p7 }
 0x1df   : > { %p1081_p0 = scmp.ne.s32.totalorder %s1621_s4, %s1080_s27  ;;  %p1086_p13 = scmp.lt.u32.totalorder %s1080_s27, %s1621_s4 }
 0x1e1   : > { %p1082_p11 = pnand %p1081_p0, %p1642_p8 }
 0x1e3   : > { %p1083_p9 = pneg %p1082_p11 }
 0x1e5   : > { %p1088_p12 = pnand %p1086_p13, %p1083_p9 }
 0x1e7   : > { %1091 = shalt.err (!%p1088_p12)
}
 0x1e8   : > { %s1186_s16 = smov 128   ;;  %s1187_s24 = smov 8  }
 0x1e9   : > { %p1643_p3 = pmov %p1641_p7  ;;  %s878_s23 = smul.u32 768, %s1242_s22 }
 0x1ea   : > { %s653_s14 = sshll.u32 %s1429_s8, 4  ;;  %s627_s9 = scalar_lea.sflag [#allocation16], %s1418_s26  ;;  %s1565_s14 = int_to_ptr.vmem [resolvable:$true] %s653_s14 }
 0x1eb   : > { %894 = dma.vmem_to_hbm [thread:$0]  (%p1643_p3), %s638_s11, 512, %s1621_s4, [#allocation7], %s1186_s16, %s1186_s16, %s1187_s24  }
 0x1ec   : > { %s1570_s27 = scalar_lea.hbm %s1622_s5, %s878_s23  ;;  %s1092_s10 = scalar_lea.vmem %s1565_s14, 768 }
 0x1ed   : > { %p1093_p7 = scmp.ne.s32.totalorder %s1565_s14, %s1092_s10  ;;  %p1644_p1 = scmp.ne.s32.totalorder %s1631_s13, 0 }
 0x1ee   : > { %s1188_s28 = smov [#allocation15]  }
 0x1ef   : > { %p1094_p2 = pnand %p1093_p7, %p1644_p1  ;;  %s1096_s11 = sshll.u32 %s1188_s28, 4  ;;  %s1097_s11 = int_to_ptr.vmem [resolvable:$false] %s1096_s11 }
 0x1f0   : > { %s1098_s8 = scalar_lea.vmem %s1097_s11, 1536  ;;  %p1099_p5 = scmp.lt.s32.totalorder %s1565_s14, %s1097_s11 }
 0x1f1   : > { %p1095_p6 = pneg %p1094_p2  ;;  %p1100_p10 = scmp.lt.s32.totalorder %s1098_s8, %s1092_s10 }
 0x1f3   : > { %p1101_p4 = por %p1100_p10, %p1099_p5 }
 0x1f5   : > { %p1102_p0 = pnand %p1101_p4, %p1095_p6 }
 0x1f7   : > { %1105 = shalt.err (!%p1102_p0)
}
 0x1f8   : > { %s1106_s15 = scalar_lea.hbm %s1570_s27, 768  ;;  %s1110_s17 = scalar_lea.hbm %s1622_s5, 3072 }
 0x1f9   : > { %p1107_p8 = scmp.ne.s32.totalorder %s1570_s27, %s1106_s15  ;;  %p1111_p13 = scmp.lt.u32.totalorder %s1570_s27, %s1622_s5 }
 0x1fa   : > { %p1112_p12 = scmp.lt.u32.totalorder %s1110_s17, %s1106_s15  ;;  %p1114_p7 = scmp.lt.u32.totalorder %s1106_s15, %s1570_s27 }
 0x1fb   : > { %p1108_p11 = pnand %p1107_p8, %p1644_p1 }
 0x1fc   : > { %p1113_p3 = por %p1112_p12, %p1111_p13 }
 0x1fd   : > { %p1109_p9 = pneg %p1108_p11 }
 0x1fe   : > { %p1115_p2 = por %p1114_p7, %p1113_p3 }
 0x200   : > { %p1116_p6 = pnand %p1115_p2, %p1109_p9 }
 0x202   : > { %1119 = shalt.err (!%p1116_p6)
}
 0x203   : > { %s1189_s6 = smov 64   ;;  %s1190_s7 = smov 4  }
 0x204   : > { %895 = dma.vmem_to_hbm [thread:$0]  (%p1644_p1), %s1565_s14, 768, %s1570_s27, %s627_s9, %s1189_s6, %s1189_s6, %s1190_s7  }
 0x205   : > { %p1645_p5 = scmp.eq.s32.totalorder %s1242_s22, 3 }
 0x207   : > { %1153 = dma.done.wait (%p1645_p5), [#allocation7], 512   ;;  %p1646_p10 = pmov %p1645_p5 }
 0x209   : > { %1155 = vsyncadd (%p1646_p10), [#allocation7], 4294966784 }
 0x20a PF: > { %p926_p4 = scmp.ge.s32.totalorder %s1174_s21, 2  ;;  %s672_s10 = sand.u32 1, %s1162_s18  }
 0x20b   : > { %p1647_p0 = scmp.ne.s32.totalorder %s1627_s25, 0  ;;  %s673_s28 = scalar_lea.sflag [#allocation16], %s672_s10 }
 0x20d   : > { %p914_p8 = pnand %p926_p4, %p1647_p0 }
 0x20f   : > { %1157 = dma.done.wait (!%p914_p8), %s673_s28, 768  }
 0x210   : > { %1159 = vsyncadd (!%p914_p8), %s673_s28, 4294966528  ;;  %p23_p1 = scmp.ge.s32.totalorder %s1277_s30, 6   ;;  %s1648_s18 = smov %s1166_s19 }
 0x211   : > { %s1649_s19 = smov %s1170_s20  ;;  %s1650_s20 = smov %s1351_s12 }
 0x212   : > { %s1651_s21 = smov %s1277_s30  ;;  %25 = sbr.rel (!%p23_p1) target bundleno = 9 (0x9), region = 118 }
 0x219   :  { %678 = vsyncpa [#allocation6], 1 }
 0x21a   :  { %680 = vsyncpa [#allocation6 + $0x1], 1 }
 0x21b   :  { %681 = vsyncpa [#allocation13], 1 }
 0x21c   :  { %683 = vsyncpa [#allocation13 + $0x1], 1 }
 0x21d   :  { %684 = vsyncpa [#allocation7], 1 }
 0x21e   :  { %686 = vsyncpa [#allocation7 + $0x1], 1 }
 0x21f   :  { %687 = vsyncpa [#allocation16], 1 }
 0x220   :  { %689 = vsyncpa [#allocation16 + $0x1], 1 }
 0x221   :  { %690 = vsyncpa [#allocation8], 1 }
 0x222   :  { %692 = vsyncpa [#allocation8 + $0x1], 1 }
 0x223   :  { %693 = vsyncpa [#allocation10], 1 }

</bundles_post_ra>
